<compile_context>
chip_gen: v6e
topology: v6e:2x2x1
jax: 0.10.0
libtpu: 0.0.40
codegen_flags: <defaults>
</compile_context>

<pallas_src>
import jax
import jax.numpy as jnp
from jax import lax
from jax.experimental import pallas as pl
from jax.experimental.pallas import tpu as pltpu


def _match_kernel(det_ref, aim_ref,
                  wproj_ref, bproj_ref,
                  wout_ref, bout_ref,
                  gw_ref, gb_ref,
                  non_det_ref, act_det_ref, act_aim_ref, cw_ref):
    det = det_ref[0]                      # (C, Nd) f32
    aim = aim_ref[0]                      # (C, Na) f32
    C, Nd = det.shape
    Na = aim.shape[1]

    det_b = det.astype(jnp.bfloat16)
    aim_b = aim.astype(jnp.bfloat16)

    wproj = wproj_ref[...]                # (3*inter, C) bf16  rows = [g; theta; phi]
    bproj = bproj_ref[...]                # (3*inter, 1) f32
    inter = wproj.shape[0] // 3

    # Fused 1x1 convolutions (channels-first): one wide matmul per input.
    proj_d = jnp.dot(wproj, det_b, preferred_element_type=jnp.float32) + bproj  # (3i, Nd)
    proj_a = jnp.dot(wproj, aim_b, preferred_element_type=jnp.float32) + bproj  # (3i, Na)

    g_det = proj_d[0:inter]                           # (i, Nd)
    phi_d = proj_d[2 * inter:3 * inter]               # (i, Nd)
    g_aim = proj_a[0:inter]                           # (i, Na)
    theta_a = proj_a[inter:2 * inter]                 # (i, Na)

    # Affinity: f[na, nd] = sum_i theta(aim)[i, na] * phi(det)[i, nd]
    f = lax.dot_general(theta_a.astype(jnp.bfloat16), phi_d.astype(jnp.bfloat16),
                        (((0,), (0,)), ((), ())),
                        preferred_element_type=jnp.float32)        # (Na, Nd)
    f_b = f.astype(jnp.bfloat16)

    # Un-normalized non-local features (1/Nd, 1/Na are folded into W/Q weights).
    na_i = lax.dot_general(g_det.astype(jnp.bfloat16), f_b,
                           (((1,), (1,)), ((), ())),
                           preferred_element_type=jnp.float32)     # (i, Na)
    nd_i = jnp.dot(g_aim.astype(jnp.bfloat16), f_b,
                   preferred_element_type=jnp.float32)             # (i, Nd)

    wout = wout_ref[...]                  # (2C, i) bf16, BN scale & 1/N folded
    bout = bout_ref[...]                  # (2C, 1) f32, BN shift folded
    w_w, w_q = wout[:C], wout[C:]
    b_w, b_q = bout[:C], bout[C:]

    non_aim = (jnp.dot(w_w, na_i.astype(jnp.bfloat16),
                       preferred_element_type=jnp.float32) + b_w + aim)   # (C, Na)
    non_det = (jnp.dot(w_q, nd_i.astype(jnp.bfloat16),
                       preferred_element_type=jnp.float32) + b_q + det)   # (C, Nd)

    # ChannelGate(non_aim): avg & max pool over spatial (lane axis), shared MLP
    # applied once on the stacked (C, 2) [avg | max] matrix, sigmoid.
    avg_p = jnp.sum(non_aim, axis=1, keepdims=True) * (1.0 / Na)   # (C, 1)
    max_p = jnp.max(non_aim, axis=1, keepdims=True)                # (C, 1)
    pooled = jnp.concatenate([avg_p, max_p], axis=1)               # (C, 2)

    gw = gw_ref[...]                      # (2*rp, C) f32: [fc1w_pad ; fc2w^T_pad]
    gb = gb_ref[...]                      # (rp + C, 1) f32: [fc1b_pad ; fc2b]
    rp = gw.shape[0] // 2
    fc1w, fc2wT = gw[:rp], gw[rp:]
    fc1b, fc2b = gb[:rp], gb[rp:]

    h = jnp.maximum(
        jnp.dot(fc1w, pooled, preferred_element_type=jnp.float32) + fc1b, 0.0)  # (rp, 2)
    att = lax.dot_general(fc2wT, h, (((0,), (0,)), ((), ())),
                          preferred_element_type=jnp.float32) + fc2b            # (C, 2)
    cw = jax.nn.sigmoid(jnp.sum(att, axis=1, keepdims=True))                    # (C, 1)

    non_det_ref[0] = non_det
    act_det_ref[0] = non_det * cw
    act_aim_ref[0] = non_aim * cw
    cw_ref[0] = cw


def _pack_params(params, C, Nd, Na):
    """Pack the many small tensors into a few slabs; fold BN + 1/N; bf16 weights."""
    inter = params["wg"].shape[1]
    r = params["fc1w"].shape[1]
    rp = max(8, r)

    # fused g / theta / phi projection (channels-first orientation)
    w_proj = jnp.concatenate(
        [params["wg"].T, params["wt"].T, params["wp"].T], axis=0
    ).astype(jnp.bfloat16)                                              # (3i, C)
    b_proj = jnp.concatenate(
        [params["bg"], params["bt"], params["bp"]], axis=1).T           # (3i, 1) f32

    # W / Q 1x1 convs with BatchNorm scale/shift and 1/Nd, 1/Na folded in
    w_w = (params["ww"] * params["w_scale"]).T * (1.0 / Nd)             # (C, i)
    w_q = (params["wq"] * params["q_scale"]).T * (1.0 / Na)             # (C, i)
    b_w = (params["bw"] * params["w_scale"] + params["w_shift"]).T      # (C, 1)
    b_q = (params["bq"] * params["q_scale"] + params["q_shift"]).T      # (C, 1)
    w_out = jnp.concatenate([w_w, w_q], axis=0).astype(jnp.bfloat16)    # (2C, i)
    b_out = jnp.concatenate([b_w, b_q], axis=0)                         # (2C, 1) f32

    # ChannelGate MLP, reduction dim padded to >= 8 rows (zero pad is exact)
    fc1w_p = jnp.zeros((rp, C), jnp.float32).at[:r].set(params["fc1w"].T)
    fc2wT_p = jnp.zeros((rp, C), jnp.float32).at[:r].set(params["fc2w"])
    gate_w = jnp.concatenate([fc1w_p, fc2wT_p], axis=0)                 # (2rp, C) f32
    fc1b_p = jnp.zeros((rp, 1), jnp.float32).at[:r].set(params["fc1b"].T)
    gate_b = jnp.concatenate([fc1b_p, params["fc2b"].T], axis=0)        # (rp+C, 1) f32

    return w_proj, b_proj, w_out, b_out, gate_w, gate_b, inter, rp


def match_block_forward(detect, aim, params):
    """detect, aim: NCHW float32.  Returns (non_det, act_det, act_aim, c_weight) in NCHW."""
    B, C, Hd, Wd = detect.shape
    _, _, Ha, Wa = aim.shape
    Nd, Na = Hd * Wd, Ha * Wa

    det_cn = detect.reshape(B, C, Nd)     # free reshape (no transpose)
    aim_cn = aim.reshape(B, C, Na)

    (w_proj, b_proj, w_out, b_out, gate_w, gate_b,
     inter, rp) = _pack_params(params, C, Nd, Na)

    def whole(shape):
        return pl.BlockSpec(shape, lambda b: (0,) * len(shape))

    in_specs = [
        pl.BlockSpec((1, C, Nd), lambda b: (b, 0, 0)),   # detect (B, C, Nd)
        pl.BlockSpec((1, C, Na), lambda b: (b, 0, 0)),   # aim    (B, C, Na)
        whole((3 * inter, C)),                           # fused projection weights (bf16)
        whole((3 * inter, 1)),                           # fused projection biases
        whole((2 * C, inter)),                           # W/Q weights (BN + 1/N folded, bf16)
        whole((2 * C, 1)),                               # W/Q biases (BN folded)
        whole((2 * rp, C)),                              # ChannelGate MLP weights
        whole((rp + C, 1)),                              # ChannelGate MLP biases
    ]
    out_specs = [
        pl.BlockSpec((1, C, Nd), lambda b: (b, 0, 0)),   # non_det
        pl.BlockSpec((1, C, Nd), lambda b: (b, 0, 0)),   # act_det
        pl.BlockSpec((1, C, Na), lambda b: (b, 0, 0)),   # act_aim
        pl.BlockSpec((1, C, 1), lambda b: (b, 0, 0)),    # c_weight
    ]
    out_shape = [
        jax.ShapeDtypeStruct((B, C, Nd), jnp.float32),
        jax.ShapeDtypeStruct((B, C, Nd), jnp.float32),
        jax.ShapeDtypeStruct((B, C, Na), jnp.float32),
        jax.ShapeDtypeStruct((B, C, 1), jnp.float32),
    ]

    non_det_cn, act_det_cn, act_aim_cn, cw = pl.pallas_call(
        _match_kernel,
        grid=(B,),
        in_specs=in_specs,
        out_specs=out_specs,
        out_shape=out_shape,
        compiler_params=pltpu.CompilerParams(dimension_semantics=("parallel",)),
    )(det_cn, aim_cn, w_proj, b_proj, w_out, b_out, gate_w, gate_b)

    non_det = non_det_cn.reshape(B, C, Hd, Wd)
    act_det = act_det_cn.reshape(B, C, Hd, Wd)
    act_aim = act_aim_cn.reshape(B, C, Ha, Wa)
    c_weight = cw.reshape(B, C, 1, 1)
    return non_det, act_det, act_aim, c_weight


def init_params(key, C):
    """Deterministic synthetic parameters with the shapes implied by __init__.
    Conv weights are stored channels-last-style (in, out) so the pure-JAX
    reference is `x @ W`; the wrapper transposes/folds them for the kernel.
    NOTE: the PyTorch __init__ zero-inits the BN gamma/beta (which would zero
    the W/Q branches); nonzero deterministic BN params are used here so those
    branches are exercised.  BN is inference-mode (running_mean=0, running_var=1)."""
    inter = max(C // 2, 1)
    r = max(C // 16, 1)       # guard: r would be 0 for C < 16
    keys = jax.random.split(key, 12)

    def w(k, shape, scale=0.1):
        return jax.random.normal(k, shape, jnp.float32) * scale

    eps = 1e-5
    gamma_w = jnp.full((1, C), 0.5, jnp.float32)
    beta_w = jnp.full((1, C), 0.1, jnp.float32)
    gamma_q = jnp.full((1, C), 0.7, jnp.float32)
    beta_q = jnp.full((1, C), -0.05, jnp.float32)
    inv_std = 1.0 / jnp.sqrt(1.0 + eps)

    return dict(
        wg=w(keys[0], (C, inter)), bg=w(keys[1], (1, inter)),
        wt=w(keys[2], (C, inter)), bt=w(keys[3], (1, inter)),
        wp=w(keys[4], (C, inter)), bp=w(keys[5], (1, inter)),
        ww=w(keys[6], (inter, C)), bw=w(keys[7], (1, C)),
        w_scale=gamma_w * inv_std, w_shift=beta_w,
        wq=w(keys[8], (inter, C)), bq=w(keys[9], (1, C)),
        q_scale=gamma_q * inv_std, q_shift=beta_q,
        fc1w=w(keys[10], (C, r)), fc1b=jnp.zeros((1, r), jnp.float32),
        fc2w=w(keys[11], (r, C)), fc2b=jnp.zeros((1, C), jnp.float32),
    )


def reference_forward(detect, aim, params):
    """Pure-JAX f32 reference with identical semantics (for correctness check)."""
    B, C, Hd, Wd = detect.shape
    _, _, Ha, Wa = aim.shape
    Nd, Na = Hd * Wd, Ha * Wa
    det_f = jnp.transpose(detect, (0, 2, 3, 1)).reshape(B, Nd, C)
    aim_f = jnp.transpose(aim, (0, 2, 3, 1)).reshape(B, Na, C)

    g_det = det_f @ params["wg"] + params["bg"]
    g_aim = aim_f @ params["wg"] + params["bg"]
    theta_a = aim_f @ params["wt"] + params["bt"]
    phi_d = det_f @ params["wp"] + params["bp"]
    f = jnp.einsum("bnc,bmc->bnm", theta_a, phi_d)                 # (B, Na, Nd)
    non_aim_i = (f / Nd) @ g_det                                   # (B, Na, inter)
    non_det_i = (jnp.transpose(f, (0, 2, 1)) / Na) @ g_aim         # (B, Nd, inter)
    non_aim = (non_aim_i @ params["ww"] + params["bw"]) * params["w_scale"] + params["w_shift"] + aim_f
    non_det = (non_det_i @ params["wq"] + params["bq"]) * params["q_scale"] + params["q_shift"] + det_f

    def mlp(v):
        h = jnp.maximum(v @ params["fc1w"] + params["fc1b"], 0.0)
        return h @ params["fc2w"] + params["fc2b"]

    cw = jax.nn.sigmoid(mlp(jnp.mean(non_aim, axis=1)) + mlp(jnp.max(non_aim, axis=1)))  # (B, C)
    act_det = non_det * cw[:, None, :]
    act_aim = non_aim * cw[:, None, :]

    def to_nchw(x, H, W):
        return jnp.transpose(x.reshape(B, H, W, C), (0, 3, 1, 2))

    return (to_nchw(non_det, Hd, Wd), to_nchw(act_det, Hd, Wd),
            to_nchw(act_aim, Ha, Wa), cw.reshape(B, C, 1, 1))


if __name__ == "__main__":
    key = jax.random.PRNGKey(0)
    k_det, k_aim, k_par = jax.random.split(key, 3)

    B, C = 2, 32              # inter = 16, ChannelGate hidden r = 2 (padded to 8)
    Hd, Wd = 16, 16           # detect spatial -> Nd = 256 (lane-dense)
    Ha, Wa = 8, 8             # aim spatial    -> Na = 64

    detect = jax.random.normal(k_det, (B, C, Hd, Wd), jnp.float32)
    aim = jax.random.normal(k_aim, (B, C, Ha, Wa), jnp.float32)
    params = init_params(k_par, C)

    outs = jax.block_until_ready(match_block_forward(detect, aim, params))

    refs = reference_forward(detect, aim, params)
    for o, r in zip(outs, refs):
        assert o.shape == r.shape and o.dtype == r.dtype
        assert jnp.allclose(o, r, rtol=3e-2, atol=3e-2), float(jnp.max(jnp.abs(o - r)))

    print("KERNEL_OK")
</pallas_src>

<mosaic_0001>
module attributes {stable_mosaic.version = 11 : i64} {
  func.func @_match_kernel(%arg0: i32, %arg1: memref<1x32x256xf32, #tpu.memory_space<vmem>>, %arg2: memref<1x32x64xf32, #tpu.memory_space<vmem>>, %arg3: memref<48x32xbf16, #tpu.memory_space<vmem>>, %arg4: memref<48x1xf32, #tpu.memory_space<vmem>>, %arg5: memref<64x16xbf16, #tpu.memory_space<vmem>>, %arg6: memref<64x1xf32, #tpu.memory_space<vmem>>, %arg7: memref<16x32xf32, #tpu.memory_space<vmem>>, %arg8: memref<40x1xf32, #tpu.memory_space<vmem>>, %arg9: memref<1x32x256xf32, #tpu.memory_space<vmem>>, %arg10: memref<1x32x256xf32, #tpu.memory_space<vmem>>, %arg11: memref<1x32x64xf32, #tpu.memory_space<vmem>>, %arg12: memref<1x32x1xf32, #tpu.memory_space<vmem>>) attributes {dimension_semantics = [#tpu.dimension_semantics<parallel>], iteration_bounds = array<i64: 2>, scalar_prefetch = 0 : i64, scratch_operands = 0 : i64, tpu.core_type = #tpu.core_type<tc>, window_params = [{transform_indices = @transform_0, window_bounds = array<i64: 1, 32, 256>}, {transform_indices = @transform_1, window_bounds = array<i64: 1, 32, 64>}, {pipeline_mode = #tpu.pipeline_mode<synchronous>, transform_indices = @transform_2, window_bounds = array<i64: 48, 32>}, {pipeline_mode = #tpu.pipeline_mode<synchronous>, transform_indices = @transform_3, window_bounds = array<i64: 48, 1>}, {pipeline_mode = #tpu.pipeline_mode<synchronous>, transform_indices = @transform_4, window_bounds = array<i64: 64, 16>}, {pipeline_mode = #tpu.pipeline_mode<synchronous>, transform_indices = @transform_5, window_bounds = array<i64: 64, 1>}, {pipeline_mode = #tpu.pipeline_mode<synchronous>, transform_indices = @transform_6, window_bounds = array<i64: 16, 32>}, {pipeline_mode = #tpu.pipeline_mode<synchronous>, transform_indices = @transform_7, window_bounds = array<i64: 40, 1>}, {transform_indices = @transform_8, window_bounds = array<i64: 1, 32, 256>}, {transform_indices = @transform_9, window_bounds = array<i64: 1, 32, 256>}, {transform_indices = @transform_10, window_bounds = array<i64: 1, 32, 64>}, {transform_indices = @transform_11, window_bounds = array<i64: 1, 32, 1>}]} {
    %c0 = arith.constant 0 : index
    %c0_0 = arith.constant 0 : index
    %c0_1 = arith.constant 0 : index
    %0 = vector.load %arg1[%c0, %c0_0, %c0_1] : memref<1x32x256xf32, #tpu.memory_space<vmem>>, vector<1x32x256xf32>
    %1 = vector.shape_cast %0 : vector<1x32x256xf32> to vector<32x256xf32>
    %c0_2 = arith.constant 0 : index
    %c0_3 = arith.constant 0 : index
    %c0_4 = arith.constant 0 : index
    %2 = vector.load %arg2[%c0_2, %c0_3, %c0_4] : memref<1x32x64xf32, #tpu.memory_space<vmem>>, vector<1x32x64xf32>
    %3 = vector.shape_cast %2 : vector<1x32x64xf32> to vector<32x64xf32>
    %4 = arith.truncf %1 : vector<32x256xf32> to vector<32x256xbf16>
    %5 = arith.truncf %3 : vector<32x64xf32> to vector<32x64xbf16>
    %c0_5 = arith.constant 0 : index
    %c0_6 = arith.constant 0 : index
    %6 = vector.load %arg3[%c0_5, %c0_6] : memref<48x32xbf16, #tpu.memory_space<vmem>>, vector<48x32xbf16>
    %c0_7 = arith.constant 0 : index
    %c0_8 = arith.constant 0 : index
    %7 = vector.load %arg4[%c0_7, %c0_8] : memref<48x1xf32, #tpu.memory_space<vmem>>, vector<48x1xf32>
    %cst = arith.constant dense<0.000000e+00> : vector<48x256xf32>
    %8 = tpu.matmul %6, %4, %cst {dimension_numbers = #tpu.dot_dimension_numbers<[1], [0], [0], [1], [0, 0, 1, 1], [], []>} : vector<48x32xbf16>, vector<32x256xbf16>, vector<48x256xf32> -> vector<48x256xf32>
    %9 = vector.broadcast %7 : vector<48x1xf32> to vector<48x256xf32>
    %10 = arith.addf %8, %9 : vector<48x256xf32>
    %cst_9 = arith.constant dense<0.000000e+00> : vector<48x64xf32>
    %11 = tpu.matmul %6, %5, %cst_9 {dimension_numbers = #tpu.dot_dimension_numbers<[1], [0], [0], [1], [0, 0, 1, 1], [], []>} : vector<48x32xbf16>, vector<32x64xbf16>, vector<48x64xf32> -> vector<48x64xf32>
    %12 = vector.broadcast %7 : vector<48x1xf32> to vector<48x64xf32>
    %13 = arith.addf %11, %12 : vector<48x64xf32>
    %14 = vector.extract_strided_slice %10 {offsets = [0, 0], sizes = [16, 256], strides = [1, 1]} : vector<48x256xf32> to vector<16x256xf32>
    %15 = vector.extract_strided_slice %10 {offsets = [32, 0], sizes = [16, 256], strides = [1, 1]} : vector<48x256xf32> to vector<16x256xf32>
    %16 = vector.extract_strided_slice %13 {offsets = [0, 0], sizes = [16, 64], strides = [1, 1]} : vector<48x64xf32> to vector<16x64xf32>
    %17 = vector.extract_strided_slice %13 {offsets = [16, 0], sizes = [16, 64], strides = [1, 1]} : vector<48x64xf32> to vector<16x64xf32>
    %18 = arith.truncf %17 : vector<16x64xf32> to vector<16x64xbf16>
    %19 = arith.truncf %15 : vector<16x256xf32> to vector<16x256xbf16>
    %cst_10 = arith.constant dense<0.000000e+00> : vector<64x256xf32>
    %20 = tpu.matmul %18, %19, %cst_10 {dimension_numbers = #tpu.dot_dimension_numbers<[0], [0], [1], [1], [0, 1, 1, 1], [], []>} : vector<16x64xbf16>, vector<16x256xbf16>, vector<64x256xf32> -> vector<64x256xf32>
    %21 = arith.truncf %20 : vector<64x256xf32> to vector<64x256xbf16>
    %22 = arith.truncf %14 : vector<16x256xf32> to vector<16x256xbf16>
    %cst_11 = arith.constant dense<0.000000e+00> : vector<16x64xf32>
    %23 = tpu.matmul %22, %21, %cst_11 {dimension_numbers = #tpu.dot_dimension_numbers<[1], [1], [0], [0], [0, 0, 1, 0], [], []>} : vector<16x256xbf16>, vector<64x256xbf16>, vector<16x64xf32> -> vector<16x64xf32>
    %24 = arith.truncf %16 : vector<16x64xf32> to vector<16x64xbf16>
    %cst_12 = arith.constant dense<0.000000e+00> : vector<16x256xf32>
    %25 = tpu.matmul %24, %21, %cst_12 {dimension_numbers = #tpu.dot_dimension_numbers<[1], [0], [0], [1], [0, 0, 1, 1], [], []>} : vector<16x64xbf16>, vector<64x256xbf16>, vector<16x256xf32> -> vector<16x256xf32>
    %c0_13 = arith.constant 0 : index
    %c0_14 = arith.constant 0 : index
    %26 = vector.load %arg5[%c0_13, %c0_14] : memref<64x16xbf16, #tpu.memory_space<vmem>>, vector<64x16xbf16>
    %c0_15 = arith.constant 0 : index
    %c0_16 = arith.constant 0 : index
    %27 = vector.load %arg6[%c0_15, %c0_16] : memref<64x1xf32, #tpu.memory_space<vmem>>, vector<64x1xf32>
    %28 = vector.extract_strided_slice %26 {offsets = [0, 0], sizes = [32, 16], strides = [1, 1]} : vector<64x16xbf16> to vector<32x16xbf16>
    %29 = vector.extract_strided_slice %26 {offsets = [32, 0], sizes = [32, 16], strides = [1, 1]} : vector<64x16xbf16> to vector<32x16xbf16>
    %30 = vector.extract_strided_slice %27 {offsets = [0, 0], sizes = [32, 1], strides = [1, 1]} : vector<64x1xf32> to vector<32x1xf32>
    %31 = vector.extract_strided_slice %27 {offsets = [32, 0], sizes = [32, 1], strides = [1, 1]} : vector<64x1xf32> to vector<32x1xf32>
    %32 = arith.truncf %23 : vector<16x64xf32> to vector<16x64xbf16>
    %cst_17 = arith.constant dense<0.000000e+00> : vector<32x64xf32>
    %33 = tpu.matmul %28, %32, %cst_17 {dimension_numbers = #tpu.dot_dimension_numbers<[1], [0], [0], [1], [0, 0, 1, 1], [], []>} : vector<32x16xbf16>, vector<16x64xbf16>, vector<32x64xf32> -> vector<32x64xf32>
    %34 = vector.broadcast %30 : vector<32x1xf32> to vector<32x64xf32>
    %35 = arith.addf %33, %34 : vector<32x64xf32>
    %36 = arith.addf %35, %3 : vector<32x64xf32>
    %37 = arith.truncf %25 : vector<16x256xf32> to vector<16x256xbf16>
    %cst_18 = arith.constant dense<0.000000e+00> : vector<32x256xf32>
    %38 = tpu.matmul %29, %37, %cst_18 {dimension_numbers = #tpu.dot_dimension_numbers<[1], [0], [0], [1], [0, 0, 1, 1], [], []>} : vector<32x16xbf16>, vector<16x256xbf16>, vector<32x256xf32> -> vector<32x256xf32>
    %39 = vector.broadcast %31 : vector<32x1xf32> to vector<32x256xf32>
    %40 = arith.addf %38, %39 : vector<32x256xf32>
    %41 = arith.addf %40, %1 : vector<32x256xf32>
    %cst_19 = arith.constant dense<0.000000e+00> : vector<32xf32>
    %42 = vector.multi_reduction <add>, %36, %cst_19 [1] : vector<32x64xf32> to vector<32xf32>
    %43 = vector.shape_cast %42 : vector<32xf32> to vector<32x1xf32>
    %cst_20 = arith.constant 1.562500e-02 : f32
    %44 = vector.broadcast %cst_20 : f32 to vector<32x1xf32>
    %45 = arith.mulf %43, %44 : vector<32x1xf32>
    %cst_21 = arith.constant dense<0xFF800000> : vector<32xf32>
    %46 = vector.multi_reduction <maximumf>, %36, %cst_21 [1] : vector<32x64xf32> to vector<32xf32>
    %47 = vector.shape_cast %46 : vector<32xf32> to vector<32x1xf32>
    %48 = tpu.concatenate %45, %47 in 1 : vector<32x1xf32>, vector<32x1xf32> -> vector<32x2xf32>
    %c0_22 = arith.constant 0 : index
    %c0_23 = arith.constant 0 : index
    %49 = vector.load %arg7[%c0_22, %c0_23] : memref<16x32xf32, #tpu.memory_space<vmem>>, vector<16x32xf32>
    %c0_24 = arith.constant 0 : index
    %c0_25 = arith.constant 0 : index
    %50 = vector.load %arg8[%c0_24, %c0_25] : memref<40x1xf32, #tpu.memory_space<vmem>>, vector<40x1xf32>
    %51 = vector.extract_strided_slice %49 {offsets = [0, 0], sizes = [8, 32], strides = [1, 1]} : vector<16x32xf32> to vector<8x32xf32>
    %52 = vector.extract_strided_slice %49 {offsets = [8, 0], sizes = [8, 32], strides = [1, 1]} : vector<16x32xf32> to vector<8x32xf32>
    %53 = vector.extract_strided_slice %50 {offsets = [0, 0], sizes = [8, 1], strides = [1, 1]} : vector<40x1xf32> to vector<8x1xf32>
    %54 = vector.extract_strided_slice %50 {offsets = [8, 0], sizes = [32, 1], strides = [1, 1]} : vector<40x1xf32> to vector<32x1xf32>
    %cst_26 = arith.constant dense<0.000000e+00> : vector<8x2xf32>
    %55 = tpu.matmul %51, %48, %cst_26 {dimension_numbers = #tpu.dot_dimension_numbers<[1], [0], [0], [1], [0, 0, 1, 1], [], []>} : vector<8x32xf32>, vector<32x2xf32>, vector<8x2xf32> -> vector<8x2xf32>
    %56 = vector.broadcast %53 : vector<8x1xf32> to vector<8x2xf32>
    %57 = arith.addf %55, %56 : vector<8x2xf32>
    %cst_27 = arith.constant 0.000000e+00 : f32
    %58 = vector.broadcast %cst_27 : f32 to vector<8x2xf32>
    %59 = arith.maximumf %57, %58 : vector<8x2xf32>
    %cst_28 = arith.constant dense<0.000000e+00> : vector<32x2xf32>
    %60 = tpu.matmul %52, %59, %cst_28 {dimension_numbers = #tpu.dot_dimension_numbers<[0], [0], [1], [1], [0, 1, 1, 1], [], []>} : vector<8x32xf32>, vector<8x2xf32>, vector<32x2xf32> -> vector<32x2xf32>
    %61 = vector.broadcast %54 : vector<32x1xf32> to vector<32x2xf32>
    %62 = arith.addf %60, %61 : vector<32x2xf32>
    %cst_29 = arith.constant dense<0.000000e+00> : vector<32xf32>
    %63 = vector.multi_reduction <add>, %62, %cst_29 [1] : vector<32x2xf32> to vector<32xf32>
    %64 = vector.shape_cast %63 : vector<32xf32> to vector<32x1xf32>
    %65 = arith.negf %64 : vector<32x1xf32>
    %66 = math.exp %65 : vector<32x1xf32>
    %cst_30 = arith.constant 1.000000e+00 : f32
    %67 = vector.broadcast %cst_30 : f32 to vector<32x1xf32>
    %68 = arith.addf %67, %66 : vector<32x1xf32>
    %69 = arith.divf %67, %68 : vector<32x1xf32>
    %c0_31 = arith.constant 0 : index
    %c0_32 = arith.constant 0 : index
    %c0_33 = arith.constant 0 : index
    %70 = vector.load %arg9[%c0_31, %c0_32, %c0_33] : memref<1x32x256xf32, #tpu.memory_space<vmem>>, vector<1x32x256xf32>
    %71 = vector.shape_cast %70 : vector<1x32x256xf32> to vector<32x256xf32>
    %72 = vector.shape_cast %41 : vector<32x256xf32> to vector<1x32x256xf32>
    tpu.vector_store %arg9[%c0_31, %c0_32, %c0_33], %72 {strides = array<i32>} : memref<1x32x256xf32, #tpu.memory_space<vmem>>, vector<1x32x256xf32>,
    %73 = vector.broadcast %69 : vector<32x1xf32> to vector<32x256xf32>
    %74 = arith.mulf %41, %73 : vector<32x256xf32>
    %c0_34 = arith.constant 0 : index
    %c0_35 = arith.constant 0 : index
    %c0_36 = arith.constant 0 : index
    %75 = vector.load %arg10[%c0_34, %c0_35, %c0_36] : memref<1x32x256xf32, #tpu.memory_space<vmem>>, vector<1x32x256xf32>
    %76 = vector.shape_cast %75 : vector<1x32x256xf32> to vector<32x256xf32>
    %77 = vector.shape_cast %74 : vector<32x256xf32> to vector<1x32x256xf32>
    tpu.vector_store %arg10[%c0_34, %c0_35, %c0_36], %77 {strides = array<i32>} : memref<1x32x256xf32, #tpu.memory_space<vmem>>, vector<1x32x256xf32>,
    %78 = vector.broadcast %69 : vector<32x1xf32> to vector<32x64xf32>
    %79 = arith.mulf %36, %78 : vector<32x64xf32>
    %c0_37 = arith.constant 0 : index
    %c0_38 = arith.constant 0 : index
    %c0_39 = arith.constant 0 : index
    %80 = vector.load %arg11[%c0_37, %c0_38, %c0_39] : memref<1x32x64xf32, #tpu.memory_space<vmem>>, vector<1x32x64xf32>
    %81 = vector.shape_cast %80 : vector<1x32x64xf32> to vector<32x64xf32>
    %82 = vector.shape_cast %79 : vector<32x64xf32> to vector<1x32x64xf32>
    tpu.vector_store %arg11[%c0_37, %c0_38, %c0_39], %82 {strides = array<i32>} : memref<1x32x64xf32, #tpu.memory_space<vmem>>, vector<1x32x64xf32>,
    %c0_40 = arith.constant 0 : index
    %c0_41 = arith.constant 0 : index
    %c0_42 = arith.constant 0 : index
    %83 = vector.load %arg12[%c0_40, %c0_41, %c0_42] : memref<1x32x1xf32, #tpu.memory_space<vmem>>, vector<1x32x1xf32>
    %84 = vector.shape_cast %83 : vector<1x32x1xf32> to vector<32x1xf32>
    %85 = vector.shape_cast %69 : vector<32x1xf32> to vector<1x32x1xf32>
    tpu.vector_store %arg12[%c0_40, %c0_41, %c0_42], %85 {strides = array<i32>} : memref<1x32x1xf32, #tpu.memory_space<vmem>>, vector<1x32x1xf32>,
    return
  }
  func.func @transform_0(%arg0: i32) -> (i32, i32, i32) {
    %c0_i32 = arith.constant 0 : i32
    %c0_i32_0 = arith.constant 0 : i32
    %c0_i32_1 = arith.constant 0 : i32
    return %arg0, %c0_i32, %c0_i32_0 : i32, i32, i32
  }
  func.func @transform_1(%arg0: i32) -> (i32, i32, i32) {
    %c0_i32 = arith.constant 0 : i32
    %c0_i32_0 = arith.constant 0 : i32
    %c0_i32_1 = arith.constant 0 : i32
    return %arg0, %c0_i32, %c0_i32_0 : i32, i32, i32
  }
  func.func @transform_2(%arg0: i32) -> (i32, i32) {
    %c0_i32 = arith.constant 0 : i32
    %c0_i32_0 = arith.constant 0 : i32
    %c0_i32_1 = arith.constant 0 : i32
    return %c0_i32, %c0_i32_0 : i32, i32
  }
  func.func @transform_3(%arg0: i32) -> (i32, i32) {
    %c0_i32 = arith.constant 0 : i32
    %c0_i32_0 = arith.constant 0 : i32
    %c0_i32_1 = arith.constant 0 : i32
    return %c0_i32, %c0_i32_0 : i32, i32
  }
  func.func @transform_4(%arg0: i32) -> (i32, i32) {
    %c0_i32 = arith.constant 0 : i32
    %c0_i32_0 = arith.constant 0 : i32
    %c0_i32_1 = arith.constant 0 : i32
    return %c0_i32, %c0_i32_0 : i32, i32
  }
  func.func @transform_5(%arg0: i32) -> (i32, i32) {
    %c0_i32 = arith.constant 0 : i32
    %c0_i32_0 = arith.constant 0 : i32
    %c0_i32_1 = arith.constant 0 : i32
    return %c0_i32, %c0_i32_0 : i32, i32
  }
  func.func @transform_6(%arg0: i32) -> (i32, i32) {
    %c0_i32 = arith.constant 0 : i32
    %c0_i32_0 = arith.constant 0 : i32
    %c0_i32_1 = arith.constant 0 : i32
    return %c0_i32, %c0_i32_0 : i32, i32
  }
  func.func @transform_7(%arg0: i32) -> (i32, i32) {
    %c0_i32 = arith.constant 0 : i32
    %c0_i32_0 = arith.constant 0 : i32
    %c0_i32_1 = arith.constant 0 : i32
    return %c0_i32, %c0_i32_0 : i32, i32
  }
  func.func @transform_8(%arg0: i32) -> (i32, i32, i32) {
    %c0_i32 = arith.constant 0 : i32
    %c0_i32_0 = arith.constant 0 : i32
    %c0_i32_1 = arith.constant 0 : i32
    return %arg0, %c0_i32, %c0_i32_0 : i32, i32, i32
  }
  func.func @transform_9(%arg0: i32) -> (i32, i32, i32) {
    %c0_i32 = arith.constant 0 : i32
    %c0_i32_0 = arith.constant 0 : i32
    %c0_i32_1 = arith.constant 0 : i32
    return %arg0, %c0_i32, %c0_i32_0 : i32, i32, i32
  }
  func.func @transform_10(%arg0: i32) -> (i32, i32, i32) {
    %c0_i32 = arith.constant 0 : i32
    %c0_i32_0 = arith.constant 0 : i32
    %c0_i32_1 = arith.constant 0 : i32
    return %arg0, %c0_i32, %c0_i32_0 : i32, i32, i32
  }
  func.func @transform_11(%arg0: i32) -> (i32, i32, i32) {
    %c0_i32 = arith.constant 0 : i32
    %c0_i32_0 = arith.constant 0 : i32
    %c0_i32_1 = arith.constant 0 : i32
    return %arg0, %c0_i32, %c0_i32_0 : i32, i32, i32
  }
}

</mosaic_0001>

<bundles_post_ra>
// kernel: tpu_custom_call.1
= control target key start
LH: loop header
LB: loop body
LE: loop exit
PB: predicated region body
PF: predicated region fallthrough
CT: control target
= control target key end

     0   :  { %s2489_s0 = inlined_call_operand.vmem [shape: f32[2,32,256], index: 0, kind: input, shape index: {}]   ;;  %s2490_s1 = inlined_call_operand.vmem [shape: f32[2,32,64], index: 1, kind: input, shape index: {}]   ;;  %s2491_s2 = inlined_call_operand.vmem [shape: bf16[48,32], index: 2, kind: input, shape index: {}]   ;;  %s2492_s3 = inlined_call_operand.vmem [shape: f32[48,1], index: 3, kind: input, shape index: {}]   ;;  %s2493_s4 = inlined_call_operand.vmem [shape: bf16[64,16], index: 4, kind: input, shape index: {}]   ;;  %s2494_s5 = inlined_call_operand.vmem [shape: f32[64,1], index: 5, kind: input, shape index: {}]   ;;  %s2495_s6 = inlined_call_operand.vmem [shape: f32[16,32], index: 6, kind: input, shape index: {}]   ;;  %s2496_s7 = inlined_call_operand.vmem [shape: f32[40,1], index: 7, kind: input, shape index: {}]   ;;  %s2497_s8 = inlined_call_operand.hbm [shape: f32[2,32,256], index: 8, kind: output, shape index: {0}]   ;;  %s2498_s9 = inlined_call_operand.hbm [shape: f32[2,32,256], index: 9, kind: output, shape index: {1}]   ;;  %s2499_s10 = inlined_call_operand.hbm [shape: f32[2,32,64], index: 10, kind: output, shape index: {2}]   ;;  %s2500_s11 = inlined_call_operand.vmem [shape: f32[2,32,1], index: 11, kind: output, shape index: {3}]  }
   0x1   :  { %2510 = sst [smem:[#allocation12_spill]] %s2489_s0 }
   0x2   :  { %17 = vsyncpa [#allocation3], 0 }
   0x3   :  { %19 = vsyncpa [#allocation3 + $0x1], 0 }
   0x4   :  { %20 = vsyncpa [#allocation5], 0 }
   0x5   :  { %22 = vsyncpa [#allocation5 + $0x1], 0  ;;  %s1999_s17 = smov 0   ;;  %s2001_s18 = smov 0  }
   0x6   :  { %s2003_s19 = smov 0   ;;  %s2005_s20 = smov 0  }
   0x7 LB: > { %2511 = sst [smem:[#allocation9_spill]] %s1923_s19  ;;  %s2020_s21 = sadd.s32 4294967295, %s1927_s20   ;;  %s1927_s20 = sphi %s2005_s20, %s2524_s20   ;;  %s1923_s19 = sphi %s2003_s19, %s2526_s19   ;;  %s1919_s18 = sphi %s2001_s18, %s2528_s18   ;;  %s1915_s17 = sphi %s1999_s17, %s2527_s17  }
   0x8   : > { %s2501_s22 = sadd.s32 4294967294, %s1927_s20   ;;  %s2024_s23 = sadd.s32 1, %s1927_s20  }
   0x9   : > { %2512 = sst [smem:[#allocation10_spill]] %s2024_s23  ;;  %s213_s24 = sadd.s32 1, %s1923_s19 }
   0xa   : > { %s210_s25 = ssub.s32 %s1927_s20, %s2024_s23  ;;  %p223_p0 = scmp.ne.s32.totalorder %s1923_s19, %s1919_s18 }
   0xb   : > { %p211_p1 = scmp.eq.s32.totalorder %s210_s25, 0  ;;  %p224_p2 = scmp.eq.s32.totalorder %s2020_s21, 1 }
   0xc   : > { %p229_p3 = scmp.ne.s32.totalorder %s1919_s18, %s1915_s17  ;;  %p230_p4 = scmp.eq.s32.totalorder %s2501_s22, 1 }
   0xd   : > { %s2037_s26 = scalar_select %p211_p1, %s1923_s19, %s213_s24  }
   0xe   : > { %p2039_p5 = por %p224_p2, %p223_p0  ;;  %p2043_p6 = por %p230_p4, %p229_p3 }
   0xf   : > { %2513 = sst [smem:[#allocation11_spill]] %s2037_s26  ;;  %p1613_p7 = scmp.ge.s32.totalorder %s1927_s20, 1 }
  0x10   : > { %p360_p8 = scmp.lt.s32.totalorder %s1927_s20, 3 }
  0x12   : > { %p361_p9 = pnand %p1613_p7, %p360_p8 }
  0x13   : > { %p420_p10 = scmp.lt.s32.totalorder (!%p361_p9), %s2020_s21, 1  ;;  %s2516_s0 = sld [smem:[#allocation12_spill]] (!%p361_p9) }
  0x14   : > { %364 = sbr.rel (%p361_p9) target bundleno = 1787 (0x6fb), region = 52  ;;  %s2273_s23 = sand.u32 (!%p361_p9), 1, %s1919_s18  }
  0x15   : > { %s1932_s25 = smov (!%p361_p9), [#allocation2]  }
  0x16   : > { %s1815_s13 = sshll.u32 (!%p361_p9), %s1932_s25, 4  ;;  %s1816_s13 = int_to_ptr.vmem [resolvable:$false] %s1815_s13 }
  0x17   : > { %s1817_s14 = scalar_lea.vmem (!%p361_p9), %s1816_s13, 2048 }
  0x19   : > { %v1929_v0 = vmov 0.0   ;;  %vm1930_vm0 = vmmov 0   ;;  %s2054_s29 = scalar_select %p420_p10, %s2020_s21, 1  ;;  %v464_v1 = vld [vmem:[%s2492_s3 + $0x20] sm:$0xff]  ;;  %v1931_v2 = vmov 0   ;;  %v462_v3 = vld [vmem:[%s2492_s3 + $0x10] sm:$0xff] }
  0x1a   : > { %1689 = vmatprep.subr.bf16.mxu1 %v1929_v0  ;;  %1693 = vmatprep.mubr.msk.bf16.mxu1 %vm1930_vm0, %v1929_v0  ;;  %v465_v4 = vld [vmem:[%s2492_s3 + $0x28] sm:$0xff]  ;;  %v463_v5 = vld [vmem:[%s2492_s3 + $0x18] sm:$0xff]  ;;  %v460_v11 = vld [vmem:[%s2492_s3] sm:$0xff]  ;;  %vm511_vm1 = vcmask 261120   ;;  %vm654_vm2 = vcmask 130048   ;;  %vm792_vm3 = vcmask 523264  }
  0x1b   : > { %1787 = vset.pattern.permute.xlu1 %v1931_v2  ;;  %1786 = vset.pattern.permute.xlu0 %v1931_v2  ;;  %s1665_s15 = sshll.u32 %s2054_s29, 6  ;;  %s2507_s16 = sshll.u32 %s2054_s29, 5  ;;  %v1788_v23 = vld [vmem:[%s2491_s2] sm:$0xff]   ;;  %v461_v26 = vld [vmem:[%s2492_s3 + $0x8] sm:$0xff]  ;;  %v850_v27 = vld [vmem:[%s2494_s5 + $0x18] sm:$0xff]  ;;  %vm1072_vm4 = vcmask 7168  }
  0x1c   : > { %488 = vperm.xlu1 %1787, %v464_v1   ;;  %478 = vperm.xlu0 %1786, %v462_v3   ;;  %s424_s30 = scalar_lea.vmem %s2516_s0, %s1665_s15  ;;  %s429_s26 = scalar_lea.vmem %s2490_s1, %s2507_s16  ;;  %v1789_v28 = vld [vmem:[%s2491_s2 + $0x8] sm:$0xff]   ;;  %v849_v29 = vld [vmem:[%s2494_s5 + $0x10] sm:$0xff]  ;;  %v847_v31 = vld [vmem:[%s2494_s5] sm:$0xff]  ;;  %vm1215_vm5 = vcmask 64512   ;;  %vm1313_vm6 = vcmask 15360  }
  0x1d   : > { %553 = vmatprep.mubr.bf16.mxu0 %v1931_v2  ;;  %v2081_v6 = vld [vmem:[%s429_s26 + $0x10] sm:$0xff]  ;;  %v2083_v7 = vld [vmem:[%s429_s26 + $0x18] sm:$0xff]  ;;  %v2085_v8 = vld [vmem:[%s429_s26] sm:$0xff] }
  0x1e   : > { %v453_v9 = vpack.c.bf16 %v2083_v7, %v2081_v6  ;;  %v2089_v10 = vld [vmem:[%s429_s26 + $0x8] sm:$0xff]  ;;  %v2096_v13 = vld [vmem:[%s424_s30 + $0x38] sm:$0xff]  ;;  %v2100_v15 = vld [vmem:[%s424_s30 + $0x20] sm:$0xff]  ;;  %s2506_s26 = sshll.u32 %s2273_s23, 6 }
  0x1f   : > { %v2094_v12 = vld [vmem:[%s424_s30 + $0x28] sm:$0xff]  ;;  %v2102_v16 = vld [vmem:[%s424_s30 + $0x30] sm:$0xff]  ;;  %v452_v18 = vpack.c.bf16 %v2089_v10, %v2085_v8  ;;  %v2110_v20 = vld [vmem:[%s424_s30 + $0x18] sm:$0xff]  ;;  %s2284_s15 = scalar_lea.vmem [#allocation2], %s2506_s26 }
  0x20   : > { %493 = vperm.xlu1 %1787, %v465_v4   ;;  %v451_v14 = vpack.c.bf16 %v2096_v13, %v2094_v12  ;;  %v2104_v17 = vld [vmem:[%s424_s30 + $0x8] sm:$0xff]  ;;  %483 = vperm.xlu0 %1786, %v463_v5   ;;  %v450_v19 = vpack.c.bf16 %v2102_v16, %v2100_v15  ;;  %v2112_v21 = vld [vmem:[%s424_s30] sm:$0xff]  ;;  %v2114_v22 = vld [vmem:[%s424_s30 + $0x10] sm:$0xff]  ;;  %s2505_s30 = sshll.u32 %s2020_s21, 10  ;;  %s1415_s12 = sshll.u32 %s2284_s15, 4  ;;  %s2328_s12 = int_to_ptr.vmem [resolvable:$true] %s1415_s12 }
  0x21   : > { %1690 = vmatpush3.bf16.msra.mxu1 %v453_v9  ;;  %v449_v24 = vpack.c.bf16 %v2110_v20, %v2104_v17  ;;  %v448_v25 = vpack.c.bf16 %v2114_v22, %v2112_v21  ;;  %v848_v30 = vld [vmem:[%s2494_s5 + $0x8] sm:$0xff]  ;;  %v1790_v32 = vld [vmem:[%s2491_s2 + $0x10] sm:$0xff]   ;;  %s2326_s22 = scalar_lea.hbm %s2497_s8, %s2505_s30  ;;  %s1811_s24 = scalar_lea.vmem %s2328_s12, 1024 }
  0x22   : > { %1691 = vmatprep.subr.bf16.mxu1 %v1929_v0  ;;  %533 = vmatprep.subr.bf16.mxu0 %v451_v14  ;;  %p1812_p11 = scmp.ne.s32.totalorder %s2328_s12, %s1811_s24  ;;  %p1818_p0 = scmp.lt.s32.totalorder %s2328_s12, %s1816_s13 }
  0x23   : > { %534 = vmatpush1.bf16.msra.mxu0 %v450_v19  ;;  %p1819_p1 = scmp.lt.s32.totalorder %s1817_s14, %s1811_s24 }
  0x24   : > { %468 = vperm.xlu1 %1787, %v460_v11   ;;  %535 = vmatprep.subr.bf16.mxu0 %v449_v24  ;;  %p1813_p12 = pnand %p1812_p11, %p2039_p5 }
  0x25   : > { %1692 = vmatpush3.bf16.msra.mxu1 %v452_v18  ;;  %p1820_p2 = por %p1819_p1, %p1818_p0 }
  0x26   : > { %p1814_p13 = pneg %p1813_p12 }
  0x27   : > { %536 = vmatpush1.bf16.msra.mxu0 %v448_v25 }
  0x28   : > { %1694 = vmatmul.mubr.msk.bf16.vlgmr.msra.gmra.mxu1 %vm511_vm1, %v1788_v23  ;;  %473 = vperm.xlu1 %1787, %v461_v26   ;;  %p1821_p3 = pnand %p1820_p2, %p1814_p13 }
  0x29   : > { %1697 = vmatprep.mubr.msk.bf16.mxu1 %vm1930_vm0, %v1929_v0 }
  0x2a   : > { %1626 = vmatmul.mubr.msk.bf16.vlgmr.msra.gmra.mxu0 %vm511_vm1, %v1788_v23 }
  0x2b   : > { %563 = vmatprep.mubr.bf16.mxu0 %v1931_v2 }
  0x2c   : > { %873 = vperm.xlu1 %1787, %v850_v27  }
  0x30   : > { %1698 = vmatmul.mubr.msk.bf16.gmra.mxu1 %vm511_vm1, %v1789_v28  ;;  %868 = vperm.xlu1 %1787, %v849_v29  }
  0x31   : > { %1701 = vmatprep.mubr.msk.bf16.mxu1 %vm1930_vm0, %v1929_v0 }
  0x32   : > { %1627 = vmatmul.mubr.msk.bf16.gmra.mxu0 %vm511_vm1, %v1789_v28 }
  0x33   : > { %569 = vmatprep.mubr.bf16.mxu0 %v1931_v2 }
  0x34   : > { %863 = vperm.xlu1 %1787, %v848_v30  }
  0x38   : > { %858 = vperm.xlu1 %1787, %v847_v31   ;;  %1702 = vmatmul.mubr.msk.bf16.gmra.mxu1 %vm511_vm1, %v1790_v32 }
  0x3a   : > { %1628 = vmatmul.mubr.msk.bf16.gmra.mxu0 %vm511_vm1, %v1790_v32 }
  0x3b   : > { %699 = vmatprep.mubr.bf16.mxu0 %v1931_v2 }
  0x97   : > { %v489_v33 = vpop.permute.xlu1 %488  ;;  %v479_v43 = vpop.permute.xlu0 %478 }
  0x9b   : > { %v494_v34 = vpop.permute.xlu1 %493  ;;  %v484_v57 = vpop.permute.xlu0 %483 }
  0x9f   : > { %v469_v35 = vpop.permute.xlu1 %468 }
  0xa3   : > { %v474_v37 = vpop.permute.xlu1 %473 }
  0xe8   : > { %v614_v36 = vpop.f32.mrf.mxu1 }
  0xe9   : > { %v2158_v42 = vadd.f32 %v614_v36, %v469_v35 }
  0xea   : > { %v1695_v38 = vpop.f32.mrf.mxu1  ;;  %v555_v39 = vpop.f32.mrf.mxu0 }
  0xeb   : > { %v2162_v45 = vadd.f32 %v555_v39, %v469_v35 }
  0xec   : > { %v617_v40 = vpop.f32.mrf.mxu1  ;;  %v557_v41 = vpop.f32.mrf.mxu0 }
  0xed   : > { %v2160_v44 = vadd.f32 %v617_v40, %v474_v37  ;;  %v558_v49 = vadd.f32 %v557_v41, %v469_v35 }
  0xee   : > { %v1696_v46 = vpop.f32.mrf.mxu1  ;;  %v559_v47 = vpop.f32.mrf.mxu0 }
  0xef   : > { %v791_v48 = vpack.c.bf16 %v2160_v44, %v2158_v42  ;;  %v2166_v50 = vadd.f32 %v559_v47, %v474_v37  ;;  %v1792_v42 = vld [vmem:[%s2493_s4 + $0x8] sm:$0xff]  }
  0xf0   : > { %v622_v51 = vpop.f32.mrf.mxu1  ;;  %v561_v52 = vpop.f32.mrf.mxu0 }
  0xf1   : > { %v748_v53 = vpack.c.bf16 %v2166_v50, %v2162_v45  ;;  %v562_v54 = vadd.f32 %v561_v52, %v474_v37  ;;  %v623_v61 = vadd.f32 %v622_v51, %v479_v43  ;;  %v1791_v45 = vld [vmem:[%s2493_s4] sm:$0xff]  }
  0xf2   : > { %v1699_v55 = vpop.f32.mrf.mxu1  ;;  %v565_v56 = vpop.f32.mrf.mxu0 }
  0xf3   : > { %v749_v58 = vpack.c.bf16 %v562_v54, %v558_v49 }
  0xf4   : > { %v625_v59 = vpop.f32.mrf.mxu1  ;;  %v566_v60 = vpop.f32.mrf.mxu0 }
  0xf5   : > { %v626_v62 = vadd.f32 %v625_v59, %v484_v57  ;;  %782 = vmatprep.mubr.bf16.mxu1 %v749_v58 }
  0xf6   : > { %v1700_v63 = vpop.f32.mrf.mxu1  ;;  %v567_v1 = vpop.f32.mrf.mxu0 }
  0xf7   : > { %v635_v3 = vpack.c.bf16 %v626_v62, %v623_v61 }
  0xf8   : > { %v568_v4 = vpop.f32.mrf.mxu0  ;;  %v630_v5 = vpop.f32.mrf.mxu1 }
  0xf9   : > { %638 = vxpose.xlu0.c.b16.start.end [1/1] (short) (narrow) %v635_v3, 64 }
  0xfa   : > { %v571_v9 = vpop.f32.mrf.mxu0  ;;  %v1703_v11 = vpop.f32.mrf.mxu1 }
  0xfb   : > { %v572_v19 = vadd.f32 %v571_v9, %v489_v33 }
  0xfc   : > { %v573_v14 = vpop.f32.mrf.mxu0  ;;  %v632_v18 = vpop.f32.mrf.mxu1 }
  0xfd   : > { %v574_v25 = vadd.f32 %v573_v14, %v489_v33 }
  0xfe   : > { %v575_v23 = vpop.f32.mrf.mxu0  ;;  %v1704_v24 = vpop.f32.mrf.mxu1 }
  0xff   : > { %v576_v26 = vadd.f32 %v575_v23, %v494_v34  ;;  %v1794_v23 = vld [vmem:[%s2493_s4 + $0x18] sm:$0xff]   ;;  %v874_v24 = vpop.permute.xlu1 %873 }
 0x100   : > { %v577_v27 = vpop.f32.mrf.mxu0 }
 0x101   : > { %v578_v28 = vadd.f32 %v577_v27, %v494_v34  ;;  %v636_v29 = vpack.c.bf16 %v576_v26, %v572_v19  ;;  %v1793_v19 = vld [vmem:[%s2493_s4 + $0x10] sm:$0xff]  }
 0x103   : > { %v637_v30 = vpack.c.bf16 %v578_v28, %v574_v25  ;;  %v869_v25 = vpop.permute.xlu1 %868 }
 0x105   : > { %681 = vmatprep.subr.bf16.mxu0 %v637_v30 }
 0x106   : > { %682 = vmatpush1.bf16.msra.mxu0 %v636_v29 }
 0x107   : > { %v864_v26 = vpop.permute.xlu1 %863 }
 0x10b   : > { %v859_v29 = vpop.permute.xlu1 %858 }
 0x15b   : > { %v646_v31 = vpop.trf.xlu0 }
 0x15c   : > { %1632 = vmatmul.mubr.msk.bf16.vlgmr.msra.gmra.mxu0 %vm654_vm2, %v646_v31 }
 0x15d   : > { %709 = vmatprep.mubr.bf16.mxu0 %v1931_v2 }
 0x15f   : > { %v647_v32 = vpop.trf.xlu0 }
 0x163   : > { %v648_v35 = vpop.trf.xlu0 }
 0x164   : > { %1633 = vmatmul.mubr.msk.bf16.gmra.mxu0 %vm654_vm2, %v647_v32 }
 0x165   : > { %719 = vmatprep.mubr.bf16.mxu0 %v1931_v2 }
 0x167   : > { %v649_v33 = vpop.trf.xlu0 }
 0x16c   : > { %1634 = vmatmul.mubr.msk.bf16.gmra.mxu0 %vm654_vm2, %v648_v35 }
 0x16d   : > { %729 = vmatprep.mubr.bf16.mxu0 %v1931_v2 }
 0x174   : > { %1635 = vmatmul.mubr.msk.bf16.gmra.mxu0 %vm654_vm2, %v649_v33 }
 0x175   : > { %1707 = vmatprep.mubr.msk.bf16.mxu0 %vm654_vm2, %v1791_v45 }
 0x21c   : > { %v701_v34 = vpop.f32.mrf.mxu0 }
 0x21e   : > { %v703_v36 = vpop.f32.mrf.mxu0 }
 0x220   : > { %v705_v37 = vpop.f32.mrf.mxu0 }
 0x221   : > { %v740_v1 = vpack.c.bf16 %v705_v37, %v701_v34 }
 0x222   : > { %v707_v38 = vpop.f32.mrf.mxu0 }
 0x223   : > { %v741_v63 = vpack.c.bf16 %v707_v38, %v703_v36 }
 0x224   : > { %v711_v39 = vpop.f32.mrf.mxu0 }
 0x226   : > { %v713_v40 = vpop.f32.mrf.mxu0 }
 0x228   : > { %v715_v41 = vpop.f32.mrf.mxu0 }
 0x229   : > { %v742_v62 = vpack.c.bf16 %v715_v41, %v711_v39 }
 0x22a   : > { %v717_v43 = vpop.f32.mrf.mxu0 }
 0x22b   : > { %v743_v61 = vpack.c.bf16 %v717_v43, %v713_v40 }
 0x22c   : > { %v721_v46 = vpop.f32.mrf.mxu0 }
 0x22e   : > { %v723_v47 = vpop.f32.mrf.mxu0 }
 0x230   : > { %v725_v49 = vpop.f32.mrf.mxu0 }
 0x231   : > { %v744_v60 = vpack.c.bf16 %v725_v49, %v721_v46  ;;  %v1079_v46 = vld [vmem:[%s2496_s7] sm:$0xff]  ;;  %v1081_v49 = vld [vmem:[%s2496_s7 + $0x10] sm:$0xff] }
 0x232   : > { %v727_v51 = vpop.f32.mrf.mxu0 }
 0x233   : > { %v745_v59 = vpack.c.bf16 %v727_v51, %v723_v47  ;;  %v1080_v47 = vld [vmem:[%s2496_s7 + $0x8] sm:$0xff]  ;;  %v1082_v51 = vld [vmem:[%s2496_s7 + $0x18] sm:$0xff] }
 0x234   : > { %v731_v52 = vpop.f32.mrf.mxu0 }
 0x236   : > { %v733_v54 = vpop.f32.mrf.mxu0 }
 0x238   : > { %v735_v55 = vpop.f32.mrf.mxu0 }
 0x239   : > { %v746_v58 = vpack.c.bf16 %v735_v55, %v731_v52  ;;  %v1083_v52 = vld [vmem:[%s2496_s7 + $0x20] sm:$0xff]  ;;  %v852_v55 = vld [vmem:[%s2494_s5 + $0x28] sm:$0xff] }
 0x23a   : > { %v737_v56 = vpop.f32.mrf.mxu0 }
 0x23b   : > { %v747_v57 = vpack.c.bf16 %v737_v56, %v733_v54  ;;  %v851_v54 = vld [vmem:[%s2494_s5 + $0x20] sm:$0xff]  ;;  %v853_v56 = vld [vmem:[%s2494_s5 + $0x30] sm:$0xff] }
 0x23d   : > { %758 = vmatprep.subr.bf16.mxu1 %v747_v57 }
 0x23e   : > { %759 = vmatpush1.bf16.xpose.msra.mxu1 %v746_v58 }
 0x23f   : > { %760 = vmatprep.subr.bf16.mxu1 %v745_v59 }
 0x246   : > { %761 = vmatpush1.bf16.xpose.msra.mxu1 %v744_v60 }
 0x247   : > { %762 = vmatprep.subr.bf16.mxu1 %v743_v61 }
 0x24e   : > { %763 = vmatpush1.bf16.xpose.msra.mxu1 %v742_v62 }
 0x24f   : > { %764 = vmatprep.subr.bf16.mxu1 %v741_v63 }
 0x256   : > { %765 = vmatpush1.bf16.xpose.msra.mxu1 %v740_v1 }
 0x257   : > { %804 = vmatprep.subr.bf16.mxu1 %v747_v57  ;;  %v1078_v57 = vld [vmem:[%s2495_s6 + $0x8] sm:$0xff] }
 0x25d   : > { %783 = vmatmul.mubr.bf16.vlgmr.msra.gmra.mxu1 %v748_v53 }
 0x25e   : > { %805 = vmatpush1.bf16.msra.mxu1 %v746_v58  ;;  %828 = vmatprep.mubr.bf16.mxu1 %v1931_v2 }
 0x25f   : > { %806 = vmatprep.subr.bf16.mxu1 %v745_v59 }
 0x262   : > { %807 = vmatpush1.bf16.msra.mxu1 %v744_v60 }
 0x263   : > { %808 = vmatprep.subr.bf16.mxu1 %v743_v61 }
 0x266   : > { %809 = vmatpush1.bf16.msra.mxu1 %v742_v62 }
 0x267   : > { %810 = vmatprep.subr.bf16.mxu1 %v741_v63 }
 0x26a   : > { %811 = vmatpush1.bf16.msra.mxu1 %v740_v1 }
 0x26d   : > { %1636 = vmatmul.mubr.msk.bf16.vlgmr.msra.gmra.mxu1 %vm792_vm3, %v791_v48 }
 0x26e   : > { %1015 = vmatprep.mubr.bf16.mxu1 %v1931_v2 }
 0x31d   : > { %v784_v50 = vpop.f32.mrf.mxu1 }
 0x31f   : > { %v786_v53 = vpop.f32.mrf.mxu1 }
 0x321   : > { %v787_v3 = vpop.f32.mrf.mxu1 }
 0x322   : > { %v855_v4 = vpack.c.bf16 %v787_v3, %v784_v50 }
 0x323   : > { %v789_v5 = vpop.f32.mrf.mxu1 }
 0x324   : > { %1705 = vmatprep.subr.bf16.mxu0 %v855_v4 }
 0x325   : > { %1706 = vmatpush3.bf16.msra.mxu0 %v855_v4 }
 0x326   : > { %1711 = vmatprep.subr.mxu0 %v1929_v0 }
 0x328   : > { %1708 = vmatmul.mubr.msk.bf16.vlgmr.msra.gmra.mxu0 %vm654_vm2, %v1792_v42 }
 0x329   : > { %1719 = vmatprep.mubr.msk.f32.mxu0 %vm1930_vm0, %v1929_v0 }
 0x32d   : > { %v830_v44 = vpop.f32.mrf.mxu1 }
 0x32f   : > { %v832_v48 = vpop.f32.mrf.mxu1 }
 0x331   : > { %v834_v9 = vpop.f32.mrf.mxu1 }
 0x332   : > { %v945_v18 = vpack.c.bf16 %v834_v9, %v830_v44  ;;  %v1077_v9 = vld [vmem:[%s2495_s6] sm:$0xff] }
 0x333   : > { %v836_v11 = vpop.f32.mrf.mxu1 }
 0x334   : > { %v946_v14 = vpack.c.bf16 %v836_v11, %v832_v48 }
 0x336   : > { %997 = vmatprep.subr.bf16.mxu1 %v946_v14 }
 0x337   : > { %998 = vmatpush1.bf16.msra.mxu1 %v945_v18 }
 0x33a   : > { %1643 = vmatmul.mubr.msk.bf16.vlgmr.msra.gmra.mxu1 %vm654_vm2, %v1793_v19 }
 0x33b   : > { %1025 = vmatprep.mubr.bf16.mxu1 %v1931_v2 }
 0x342   : > { %1644 = vmatmul.mubr.msk.bf16.gmra.mxu1 %vm654_vm2, %v1794_v23 }
 0x3e8   : > { %v1709_v27 = vpop.f32.mrf.mxu0 }
 0x3e9   : > { %v935_v28 = vadd.f32 %v1709_v27, %v869_v25 }
 0x3ea   : > { %v926_v30 = vpop.f32.mrf.mxu0 }
 0x3eb   : > { %v2207_v31 = vadd.f32 %v935_v28, %v2081_v6  ;;  %v927_v32 = vadd.f32 %v926_v30, %v859_v29 }
 0x3ec   : > { %v1710_v35 = vpop.f32.mrf.mxu0 }
 0x3ed   : > { %v2210_v2 = vadd.f32 %v927_v32, %v2085_v8  ;;  %v938_v33 = vadd.f32 %v1710_v35, %v874_v24  ;;  %v1050_v34 = vsel %vm792_vm3, %v2207_v31, 0.0  ;;  %v1066_v40 = vsel %vm792_vm3, %v2207_v31, -inf }
 0x3ee   : > { %1051 = vadd.xlane.f32.xlu0 %v1050_v34  ;;  %v929_v36 = vpop.f32.mrf.mxu0 }
 0x3ef   : > { %v2215_v37 = vadd.f32 %v938_v33, %v2083_v7  ;;  %v930_v38 = vadd.f32 %v929_v36, %v864_v26  ;;  %v1044_v6 = vsel %vm792_vm3, %v2210_v2, 0.0 }
 0x3f1   : > { %v1053_v39 = vsel %vm792_vm3, %v2215_v37, 0.0  ;;  %v2222_v8 = vadd.f32 %v930_v38, %v2089_v10  ;;  %v1069_v41 = vsel %vm792_vm3, %v2215_v37, -inf  ;;  %v1060_v10 = vsel %vm792_vm3, %v2210_v2, -inf }
 0x3f2   : > { %1054 = vadd.xlane.f32.xlu1 %v1053_v39  ;;  %1045 = vadd.xlane.f32.xlu0 %v1044_v6 }
 0x3f3   : > { %v1063_v7 = vsel %vm792_vm3, %v2222_v8, -inf  ;;  %v1047_v43 = vsel %vm792_vm3, %v2222_v8, 0.0 }
 0x3f6   : > { %1067 = vmax.xlane.f32.xlu1 %v1066_v40  ;;  %1070 = vmax.xlane.f32.xlu0 %v1069_v41 }
 0x3fa   : > { %1064 = vmax.xlane.f32.xlu1 %v1063_v7  ;;  %1048 = vadd.xlane.f32.xlu0 %v1047_v43  ;;  %v1017_v18 = vpop.f32.mrf.mxu1 }
 0x3fc   : > { %v1019_v23 = vpop.f32.mrf.mxu1 }
 0x3fe   : > { %1061 = vmax.xlane.f32.xlu0 %v1060_v10  ;;  %v1021_v25 = vpop.f32.mrf.mxu1 }
 0x400   : > { %v1023_v27 = vpop.f32.mrf.mxu1 }
 0x40b   : > { %1086 = vperm.xlu1 %1787, %v1079_v46  }
 0x40f   : > { %1165 = vperm.xlu1 %1787, %v1080_v47  }
 0x413   : > { %1170 = vperm.xlu1 %1787, %v1081_v49  }
 0x417   : > { %1175 = vperm.xlu1 %1787, %v1082_v51  }
 0x41b   : > { %1180 = vperm.xlu1 %1787, %v1083_v52  }
 0x41f   : > { %949 = vperm.xlu1 %1787, %v851_v54  }
 0x423   : > { %954 = vperm.xlu1 %1787, %v852_v55  }
 0x427   : > { %959 = vperm.xlu1 %1787, %v853_v56  }
 0x42b   : > { %1183 = vxpose.xlu0.b32.start.end [1/1] (short) (narrow) %v1078_v57, 32 }
 0x477   : > { %v1052_v58 = vpop.xlane.xlu0 %1051 }
 0x478   : > { %v1058_v1 = vmul.f32 0.015625, %v1052_v58 }
 0x47b   : > { %v1055_v59 = vpop.xlane.xlu1 %1054  ;;  %v1046_v60 = vpop.xlane.xlu0 %1045 }
 0x47c   : > { %v1059_v61 = vmul.f32 0.015625, %v1055_v59  ;;  %v1056_v5 = vmul.f32 0.015625, %v1046_v60 }
 0x47f   : > { %v1068_v62 = vpop.xlane.xlu1 %1067  ;;  %v1071_v63 = vpop.xlane.xlu0 %1070 }
 0x480   : > { %v1076_v45 = vsel %vm1072_vm4, %v1059_v61, %v1071_v63  ;;  %v1075_v50 = vsel %vm1072_vm4, %v1058_v1, %v1068_v62  ;;  %v854_v63 = vld [vmem:[%s2494_s5 + $0x38] sm:$0xff] }
 0x481   : > { %1712 = vmatpush3.msra.mxu0 %v1076_v45 }
 0x482   : > { %1713 = vmatprep.subr.mxu0 %v1929_v0 }
 0x483   : > { %v1065_v53 = vpop.xlane.xlu1 %1064  ;;  %1714 = vmatpush3.msra.mxu0 %v1075_v50  ;;  %v1049_v3 = vpop.xlane.xlu0 %1048 }
 0x484   : > { %v1057_v4 = vmul.f32 0.015625, %v1049_v3  ;;  %1715 = vmatprep.subr.mxu0 %v1929_v0 }
 0x486   : > { %v1074_v42 = vsel %vm1072_vm4, %v1057_v4, %v1065_v53 }
 0x487   : > { %v1087_v44 = vpop.permute.xlu1 %1086  ;;  %1716 = vmatpush3.msra.mxu0 %v1074_v42  ;;  %v1062_v48 = vpop.xlane.xlu0 %1061 }
 0x488   : > { %v1073_v11 = vsel %vm1072_vm4, %v1056_v5, %v1062_v48  ;;  %1717 = vmatprep.subr.mxu0 %v1929_v0  ;;  %v1027_v0 = vpop.f32.mrf.mxu1 }
 0x489   : > { %1718 = vmatpush3.msra.mxu0 %v1073_v11 }
 0x48a   : > { %1720 = vmatmul.mubr.msk.f32.vlgmr.msra.gmra.mxu0 %vm511_vm1, %v1077_v9  ;;  %v1029_v36 = vpop.f32.mrf.mxu1 }
 0x48b   : > { %v1166_v14 = vpop.permute.xlu1 %1165 }
 0x48c   : > { %v1031_v5 = vpop.f32.mrf.mxu1 }
 0x48e   : > { %v1033_v48 = vpop.f32.mrf.mxu1 }
 0x48f   : > { %v1171_v19 = vpop.permute.xlu1 %1170 }
 0x493   : > { %v1176_v24 = vpop.permute.xlu1 %1175 }
 0x497   : > { %v1181_v26 = vpop.permute.xlu1 %1180 }
 0x49b   : > { %v950_v28 = vpop.permute.xlu1 %949 }
 0x49c   : > { %v1018_v29 = vadd.f32 %v1017_v18, %v950_v28  ;;  %v1020_v30 = vadd.f32 %v1019_v23, %v950_v28 }
 0x49e   : > { %v2277_v32 = vadd.f32 %v1018_v29, %v2112_v21  ;;  %v2280_v35 = vadd.f32 %v1020_v30, %v2104_v17 }
 0x49f   : > { %v955_v33 = vpop.permute.xlu1 %954 }
 0x4a0   : > { %1350 = vst [vmem:[%s2284_s15] sm:$0xff] %v2277_v32  ;;  %1351 = vst [vmem:[%s2284_s15 + $0x8] sm:$0xff] %v2280_v35  ;;  %v1022_v34 = vadd.f32 %v1021_v25, %v955_v33  ;;  %v1024_v21 = vadd.f32 %v1023_v27, %v955_v33 }
 0x4a2   : > { %v2291_v17 = vadd.f32 %v1022_v34, %v2114_v22  ;;  %v2294_v38 = vadd.f32 %v1024_v21, %v2110_v20 }
 0x4a3   : > { %v960_v39 = vpop.permute.xlu1 %959 }
 0x4a4   : > { %1352 = vst [vmem:[%s2284_s15 + $0x10] sm:$0xff] %v2291_v17  ;;  %1353 = vst [vmem:[%s2284_s15 + $0x18] sm:$0xff] %v2294_v38  ;;  %v1028_v6 = vadd.f32 %v1027_v0, %v960_v39  ;;  %v1030_v40 = vadd.f32 %v1029_v36, %v960_v39 }
 0x4a6   : > { %v2301_v41 = vadd.f32 %v1028_v6, %v2100_v15  ;;  %v2304_v7 = vadd.f32 %v1030_v40, %v2094_v12 }
 0x4a7   : > { %v1199_v22 = vpop.trf.xlu0 }
 0x4a8   : > { %1354 = vst [vmem:[%s2284_s15 + $0x20] sm:$0xff] %v2301_v41  ;;  %1355 = vst [vmem:[%s2284_s15 + $0x28] sm:$0xff] %v2304_v7  ;;  %1724 = vmatprep.mubr.msk.f32.mxu0 %vm1215_vm5, %v1199_v22 }
 0x4ab   : > { %v1200_v20 = vpop.trf.xlu0 }
 0x4af   : > { %v1201_v46 = vpop.trf.xlu0 }
 0x4b3   : > { %v1202_v15 = vpop.trf.xlu0 }
 0x54a   : > { %v1158_v43 = vpop.f32.mrf.mxu0 }
 0x54b   : > { %v1159_v10 = vadd.f32 %v1158_v43, %v1087_v44 }
 0x54c   : > { %v1721_v47 = vpop.f32.mrf.mxu0 }
 0x54d   : > { %v1162_v49 = vmax.f32 %v1159_v10, 0.0 }
 0x54f   : > { %1722 = vmatprep.subr.mxu0 %v1162_v49 }
 0x550   : > { %1723 = vmatpush3.msra.mxu0 %v1162_v49 }
 0x551   : > { %1725 = vmatmul.mubr.msk.f32.vlgmr.msra.gmra.mxu0 %vm1215_vm5, %v1200_v20 }
 0x552   : > { %1727 = vmatprep.mubr.msk.f32.mxu0 %vm1215_vm5, %v1201_v46 }
 0x555   : > { %1728 = vmatmul.mubr.msk.f32.gmra.mxu0 %vm1215_vm5, %v1202_v15 }
 0x611   : > { %v1726_v12 = vpop.f32.mrf.mxu0 }
 0x612   : > { %v1300_v51 = vadd.f32 %v1726_v12, %v1171_v19 }
 0x613   : > { %v1294_v52 = vpop.f32.mrf.mxu0 }
 0x614   : > { %v1295_v54 = vadd.f32 %v1294_v52, %v1166_v14  ;;  %v1317_v55 = vsel %vm1313_vm6, %v1300_v51, 0.0 }
 0x615   : > { %1318 = vadd.xlane.f32.xlu0 %v1317_v55  ;;  %v1729_v56 = vpop.f32.mrf.mxu0 }
 0x616   : > { %v1310_v57 = vadd.f32 %v1729_v56, %v1181_v26  ;;  %v1314_v58 = vsel %vm1313_vm6, %v1295_v54, 0.0 }
 0x617   : > { %1315 = vadd.xlane.f32.xlu1 %v1314_v58  ;;  %v1304_v59 = vpop.f32.mrf.mxu0 }
 0x618   : > { %v1305_v60 = vadd.f32 %v1304_v59, %v1176_v24  ;;  %v1323_v61 = vsel %vm1313_vm6, %v1310_v57, 0.0 }
 0x61a   : > { %v1320_v62 = vsel %vm1313_vm6, %v1305_v60, 0.0 }
 0x61b   : > { %1324 = vadd.xlane.f32.xlu1 %v1323_v61 }
 0x61f   : > { %1321 = vadd.xlane.f32.xlu1 %v1320_v62 }
 0x630   : > { %964 = vperm.xlu1 %1787, %v854_v63  }
 0x69e   : > { %v1319_v1 = vpop.xlane.xlu0 %1318 }
 0x69f   : > { %v1651_v45 = vmul.f32 -1.442695, %v1319_v1 }
 0x6a0   : > { %v1316_v50 = vpop.xlane.xlu1 %1315 }
 0x6a1   : > { %1795 = vpow2.f32 %v1651_v45  ;;  %v1650_v53 = vmul.f32 -1.442695, %v1316_v50 }
 0x6a3   : > { %1797 = vpow2.f32 %v1650_v53 }
 0x6a4   : > { %v1325_v3 = vpop.xlane.xlu1 %1324 }
 0x6a5   : > { %v1653_v4 = vmul.f32 -1.442695, %v1325_v3 }
 0x6a7   : > { %1799 = vpow2.f32 %v1653_v4 }
 0x6a8   : > { %v1322_v42 = vpop.xlane.xlu1 %1321 }
 0x6a9   : > { %v1652_v44 = vmul.f32 -1.442695, %v1322_v42 }
 0x6ab   : > { %1801 = vpow2.f32 %v1652_v44 }
 0x6ac   : > { %v965_v9 = vpop.permute.xlu1 %964 }
 0x6ad   : > { %v1032_v11 = vadd.f32 %v1031_v5, %v965_v9  ;;  %v1034_v14 = vadd.f32 %v1033_v48, %v965_v9 }
 0x6ae   : > { %v1796_v18 = vpop.eup %1795 }
 0x6af   : > { %v1339_v19 = vadd.f32 1.0, %v1796_v18  ;;  %v2316_v23 = vadd.f32 %v1032_v11, %v2102_v16  ;;  %v2319_v24 = vadd.f32 %v1034_v14, %v2096_v13 }
 0x6b0   : > { %v1798_v25 = vpop.eup %1797 }
 0x6b1   : > { %1803 = vrcp.f32 %v1339_v19  ;;  %v1338_v26 = vadd.f32 1.0, %v1798_v25  ;;  %1356 = vst [vmem:[%s2284_s15 + $0x30] sm:$0xff] %v2316_v23  ;;  %1357 = vst [vmem:[%s2284_s15 + $0x38] sm:$0xff] %v2319_v24 }
 0x6b2   : > { %1824 = shalt.err (!%p1821_p3)
}
 0x6b3   : > { %s1825_s15 = scalar_lea.hbm %s2326_s22, 1024  ;;  %s1829_s25 = scalar_lea.hbm %s2497_s8, 2048 }
 0x6b4   : > { %p1826_p4 = scmp.ne.s32.totalorder %s2326_s22, %s1825_s15  ;;  %p1830_p9 = scmp.lt.s32.totalorder %s2326_s22, %s2497_s8 }
 0x6b5   : > { %p1831_p10 = scmp.lt.s32.totalorder %s1829_s25, %s1825_s15 }
 0x6b6   : > { %p1827_p7 = pnand %p1826_p4, %p2039_p5 }
 0x6b7   : > { %p1832_p11 = por %p1831_p10, %p1830_p9 }
 0x6b8   : > { %p1828_p8 = pneg %p1827_p7 }
 0x6ba   : > { %p1833_p12 = pnand %p1832_p11, %p1828_p8 }
 0x6bc   : > { %1836 = shalt.err (!%p1833_p12)
}
 0x6bd   : > { %s2508_s24 = smov 256   ;;  %s2509_s13 = smov 16   ;;  %1805 = vrcp.f32 %v1338_v26  ;;  %v1800_v13 = vpop.eup %1799 }
 0x6be   : > { %s2517_s26 = scalar_lea.sflag [#allocation3], %s2273_s23  ;;  %v1341_v16 = vadd.f32 1.0, %v1800_v13  ;;  %v1802_v27 = vpop.eup %1801  ;;  %s1616_s16 = sshll.u32 %s2273_s23, 5 }
 0x6bf   : > { %1730 = dma.vmem_to_hbm [thread:$0]  (%p2039_p5), %s2328_s12, 1024, %s2326_s22, %s2517_s26, %s2508_s24, %s2508_s24, %s2509_s13   ;;  %v1340_v28 = vadd.f32 1.0, %v1802_v27  ;;  %v1804_v29 = vpop.eup %1803 }
 0x6c0   : > { %1807 = vrcp.f32 %v1341_v16  ;;  %s2518_s30 = sshll.u32 %s2054_s29, 5  ;;  %v1360_v30 = vmul.f32 %v1804_v29, %v2291_v17  ;;  %v1361_v0 = vmul.f32 %v1804_v29, %v2294_v38  ;;  %v1375_v33 = vmul.f32 %v1804_v29, %v2222_v8  ;;  %s2519_s29 = sshll.u32 %s2273_s23, 6 }
 0x6c1   : > { %1809 = vrcp.f32 %v1340_v28  ;;  %s2366_s15 = scalar_lea.vmem %s2500_s11, %s2518_s30  ;;  %s2379_s12 = scalar_lea.vmem [#allocation4], %s2519_s29 }
 0x6c2   : > { %1383 = vst.msk [vmem:[%s2366_s15 + $0x8] sm:$0xff] %vm1072_vm4, %v1804_v29  ;;  %1368 = vst [vmem:[%s2379_s12 + $0x10] sm:$0xff] %v1360_v30  ;;  %s412_s22 = scalar_lea.vmem [#allocation6], %s1616_s16  ;;  %s1391_s23 = sand.u32 1, %s2020_s21  }
 0x6c3   : > { %1369 = vst [vmem:[%s2379_s12 + $0x18] sm:$0xff] %v1361_v0  ;;  %1379 = vst.msk [vmem:[%s412_s22 + $0x8] sm:$0xff] %vm792_vm3, %v1375_v33  ;;  %s1431_s25 = sshll.u32 %s2379_s12, 4  ;;  %s1670_s26 = sshll.u32 %s2020_s21, 9  ;;  %s2406_s25 = int_to_ptr.vmem [resolvable:$true] %s1431_s25 }
 0x6c4   : > { %s1447_s16 = sshll.u32 %s412_s22, 4  ;;  %s2520_s30 = sshll.u32 %s2020_s21, 10  ;;  %s2418_s16 = int_to_ptr.vmem [resolvable:$true] %s1447_s16 }
 0x6c5   : > { %s2404_s29 = scalar_lea.hbm %s2498_s9, %s2520_s30  ;;  %s2416_s13 = scalar_lea.hbm %s2499_s10, %s1670_s26 }
 0x6c6   : > { %s2423_s30 = scalar_lea.sflag [#allocation5], %s1391_s23  ;;  %s1935_s19 = smov [#allocation4]  }
 0x6c7   : > { %s1841_s14 = sshll.u32 %s1935_s19, 4  ;;  %s1842_s14 = int_to_ptr.vmem [resolvable:$false] %s1841_s14 }
 0x6c8   : > { %s1843_s0 = scalar_lea.vmem %s1842_s14, 2048  ;;  %p1844_p2 = scmp.lt.s32.totalorder %s2406_s25, %s1842_s14 }
 0x6ca   : > { %v1806_v34 = vpop.eup %1805 }
 0x6cb   : > { %1382 = vst.msk [vmem:[%s2366_s15] sm:$0xff] %vm1072_vm4, %v1806_v34  ;;  %v1358_v21 = vmul.f32 %v1806_v34, %v2277_v32  ;;  %v1359_v36 = vmul.f32 %v1806_v34, %v2280_v35  ;;  %v1374_v8 = vmul.f32 %v1806_v34, %v2210_v2 }
 0x6cd   : > { %1366 = vst [vmem:[%s2379_s12] sm:$0xff] %v1358_v21  ;;  %1367 = vst [vmem:[%s2379_s12 + $0x8] sm:$0xff] %v1359_v36  ;;  %v1808_v32 = vpop.eup %1807 }
 0x6ce   : > { %1378 = vst.msk [vmem:[%s412_s22] sm:$0xff] %vm792_vm3, %v1374_v8  ;;  %v1364_v35 = vmul.f32 %v1808_v32, %v2316_v23  ;;  %v1365_v17 = vmul.f32 %v1808_v32, %v2319_v24  ;;  %v1377_v2 = vmul.f32 %v1808_v32, %v2215_v37  ;;  %v1810_v38 = vpop.eup %1809 }
 0x6cf   : > { %1385 = vst.msk [vmem:[%s2366_s15 + $0x18] sm:$0xff] %vm1072_vm4, %v1808_v32  ;;  %1384 = vst.msk [vmem:[%s2366_s15 + $0x10] sm:$0xff] %vm1072_vm4, %v1810_v38  ;;  %v1362_v37 = vmul.f32 %v1810_v38, %v2301_v41  ;;  %v1363_v39 = vmul.f32 %v1810_v38, %v2304_v7  ;;  %v1376_v6 = vmul.f32 %v1810_v38, %v2207_v31  ;;  %s1837_s15 = scalar_lea.vmem %s2406_s25, 1024 }
 0x6d0   : > { %1372 = vst [vmem:[%s2379_s12 + $0x30] sm:$0xff] %v1364_v35  ;;  %1373 = vst [vmem:[%s2379_s12 + $0x38] sm:$0xff] %v1365_v17  ;;  %p1838_p13 = scmp.ne.s32.totalorder %s2406_s25, %s1837_s15  ;;  %p1845_p3 = scmp.lt.s32.totalorder %s1843_s0, %s1837_s15 }
 0x6d1   : > { %1381 = vst.msk [vmem:[%s412_s22 + $0x18] sm:$0xff] %vm792_vm3, %v1377_v2  ;;  %1370 = vst [vmem:[%s2379_s12 + $0x20] sm:$0xff] %v1362_v37 }
 0x6d2   : > { %1371 = vst [vmem:[%s2379_s12 + $0x28] sm:$0xff] %v1363_v39  ;;  %1380 = vst.msk [vmem:[%s412_s22 + $0x10] sm:$0xff] %vm792_vm3, %v1376_v6  ;;  %p1839_p0 = pnand %p1838_p13, %p2039_p5  ;;  %p1846_p4 = por %p1845_p3, %p1844_p2 }
 0x6d4   : > { %p1840_p1 = pneg %p1839_p0 }
 0x6d6   : > { %p1847_p7 = pnand %p1846_p4, %p1840_p1 }
 0x6d8   : > { %1850 = shalt.err (!%p1847_p7)
}
 0x6d9   : > { %s1851_s24 = scalar_lea.hbm %s2404_s29, 1024  ;;  %s1855_s23 = scalar_lea.hbm %s2498_s9, 2048 }
 0x6da   : > { %p1852_p8 = scmp.ne.s32.totalorder %s2404_s29, %s1851_s24  ;;  %p1856_p11 = scmp.lt.s32.totalorder %s2404_s29, %s2498_s9 }
 0x6db   : > { %p1857_p12 = scmp.lt.s32.totalorder %s1855_s23, %s1851_s24 }
 0x6dc   : > { %p1853_p9 = pnand %p1852_p8, %p2039_p5 }
 0x6dd   : > { %p1858_p13 = por %p1857_p12, %p1856_p11 }
 0x6de   : > { %p1854_p10 = pneg %p1853_p9 }
 0x6e0   : > { %p1859_p0 = pnand %p1858_p13, %p1854_p10 }
 0x6e2   : > { %1862 = shalt.err (!%p1859_p0)
}
 0x6e3   : > { %s2521_s0 = smov 16   ;;  %s2522_s15 = smov 256  }
 0x6e4   : > { %1731 = dma.vmem_to_hbm [thread:$0]  (%p2039_p5), %s2406_s25, 1024, %s2404_s29, %s2423_s30, %s2522_s15, %s2522_s15, %s2521_s0  }
 0x6e5   : > { %s1863_s19 = scalar_lea.vmem %s2418_s16, 512  ;;  %s1936_s14 = smov [#allocation6]  }
 0x6e6   : > { %p1864_p1 = scmp.ne.s32.totalorder %s2418_s16, %s1863_s19  ;;  %s1867_s24 = sshll.u32 %s1936_s14, 4  ;;  %s1868_s24 = int_to_ptr.vmem [resolvable:$false] %s1867_s24 }
 0x6e7   : > { %s1869_s12 = scalar_lea.vmem %s1868_s24, 1024  ;;  %p1870_p4 = scmp.lt.s32.totalorder %s2418_s16, %s1868_s24 }
 0x6e8   : > { %p1865_p2 = pnand %p1864_p1, %p2039_p5  ;;  %p1871_p7 = scmp.lt.s32.totalorder %s1869_s12, %s1863_s19 }
 0x6ea   : > { %p1866_p3 = pneg %p1865_p2  ;;  %p1872_p8 = por %p1871_p7, %p1870_p4 }
 0x6ec   : > { %p1873_p9 = pnand %p1872_p8, %p1866_p3 }
 0x6ee   : > { %1876 = shalt.err (!%p1873_p9)
}
 0x6ef   : > { %s1877_s22 = scalar_lea.hbm %s2416_s13, 512  ;;  %s1881_s23 = scalar_lea.hbm %s2499_s10, 1024 }
 0x6f0   : > { %p1878_p10 = scmp.ne.s32.totalorder %s2416_s13, %s1877_s22  ;;  %p1882_p13 = scmp.lt.s32.totalorder %s2416_s13, %s2499_s10 }
 0x6f1   : > { %p1883_p0 = scmp.lt.s32.totalorder %s1881_s23, %s1877_s22 }
 0x6f2   : > { %p1879_p11 = pnand %p1878_p10, %p2039_p5 }
 0x6f3   : > { %p1884_p1 = por %p1883_p0, %p1882_p13 }
 0x6f4   : > { %p1880_p12 = pneg %p1879_p11 }
 0x6f6   : > { %p1885_p2 = pnand %p1884_p1, %p1880_p12 }
 0x6f8   : > { %1888 = shalt.err (!%p1885_p2)
}
 0x6f9   : > { %s1937_s0 = smov 128   ;;  %s1938_s15 = smov 8  }
 0x6fa   : > { %1732 = dma.vmem_to_hbm [thread:$0]  (%p2039_p5), %s2418_s16, 512, %s2416_s13, %s2423_s30, %s1937_s0, %s1937_s0, %s1938_s15  }
 0x6fb PF: > { %p1746_p3 = scmp.ge.s32.totalorder %s1927_s20, 2  ;;  %s1465_s19 = sand.u32 1, %s1915_s17  }
 0x6fc   : > { %s1466_s14 = scalar_lea.sflag [#allocation3], %s1465_s19 }
 0x6fd   : > { %p1737_p4 = pnand %p1746_p3, %p2043_p6 }
 0x6ff   : > { %p1738_p7 = pneg %p1737_p4 }
 0x701   : > { %1906 = dma.done.wait (%p1738_p7), %s1466_s14, 1024  }
 0x702   : > { %1908 = vsyncadd (%p1738_p7), %s1466_s14, 4294966272  ;;  %s2523_s24 = sadd.s32 4294967294, %s1927_s20  }
 0x703   : > { %s1474_s12 = sand.u32 1, %s2523_s24  }
 0x704   : > { %s1475_s22 = scalar_lea.sflag [#allocation5], %s1474_s12 }
 0x705   : > { %1910 = dma.done.wait (%p1738_p7), %s1475_s22, 1536  }
 0x706   : > { %1912 = vsyncadd (%p1738_p7), %s1475_s22, 4294965760  ;;  %s2524_s20 = sld [smem:[#allocation10_spill]]  ;;  %s2527_s17 = smov %s1919_s18 }
 0x707   : > { %s2525_s27 = sld [smem:[#allocation9_spill]] }
 0x708   : > { %s2526_s19 = sld [smem:[#allocation11_spill]] }
 0x70c   : > { %p25_p5 = scmp.ge.s32.totalorder %s2524_s20, 4  }
 0x70d   : > { %s2528_s18 = smov %s2525_s27 }
 0x70e   :  { %27 = sbr.rel (!%p25_p5) target bundleno = 7 (0x7), region = 134 }
 0x713   :  { %1497 = vsyncpa [#allocation3], 1 }
 0x714   :  { %1499 = vsyncpa [#allocation3 + $0x1], 1 }
 0x715   :  { %1500 = vsyncpa [#allocation5], 1 }
 0x716   :  { %1502 = vsyncpa [#allocation5 + $0x1], 1 }

</bundles_post_ra>
